<compile_context>
chip_gen: v5e
topology: v5e:2x2
jax: 0.10.0
libtpu: 0.0.40
codegen_flags: <defaults>
</compile_context>

<pallas_src>
import numpy as np
import jax
import jax.numpy as jnp
from jax.experimental import pallas as pl
from jax.experimental.pallas import tpu as pltpu

# ---- synthetic backbone dims (deterministic, defined in-script) ----
C_IN = 4      # input channels of every crop
D_OUT = 32    # backbone feature dim  ("output")
D_ZS = 16     # projection dim        ("zs")
N_CLS = 8     # class-token head dim  ("output_cls")
D_TOTAL = D_OUT + D_ZS + N_CLS                  # 56
D_PAD = ((D_TOTAL + 127) // 128) * 128          # 128: lane-dense fused output width


def _vmem_capacity_bytes():
    try:
        return int(pltpu.get_tpu_info().vmem_capacity_bytes)
    except Exception:
        return 64 * 1024 * 1024   # conservative (v7x-sized) fallback, safe everywhere


def _fused_backbone_kernel(x_ref, w_ref, o_ref, acc_ref):
    # One grid step: acc(nblk,128) += x(nblk,tk) @ w(tk,128) on the MXU.
    # Pool + all three projections are already folded into the expanded weight.
    @pl.when(pl.program_id(1) == 0)
    def _():
        acc_ref[...] = jnp.zeros_like(acc_ref)

    acc_ref[...] += jnp.dot(x_ref[...], w_ref[...], preferred_element_type=jnp.float32)

    @pl.when(pl.program_id(1) == pl.num_programs(1) - 1)
    def _():
        o_ref[...] = acc_ref[...].astype(o_ref.dtype)


def _tiling_plan(n, k_dim, x_itemsize):
    """Generation-aware tile plan -> (nblk, tk, nk, vmem_limit_bytes)."""
    phys = _vmem_capacity_bytes()
    # 64 MiB scoped limit on 128 MiB parts (v5e/v6e), 32 MiB on 64 MiB parts (v7x).
    vmem_limit = max(32 << 20, min(phys // 2, 64 << 20))
    budget = (vmem_limit * 3) // 4           # headroom for Mosaic internal scratch

    # K-tile only when the expanded weight itself would hog VMEM (large C*HW); otherwise
    # keep the whole contraction resident (nk == 1).
    w_tile_budget = 8 << 20
    if k_dim % 128 == 0 and k_dim * D_PAD * 4 > w_tile_budget:
        tk = max(128, (w_tile_budget // (D_PAD * 4)) // 128 * 128)
        while k_dim % tk:
            tk -= 128
    else:
        tk = k_dim
    nk = k_dim // tk

    w_bufs = 1 if nk == 1 else 2                         # resident weight: single buffer
    w_bytes = w_bufs * tk * D_PAD * 4
    per_row = 2 * tk * x_itemsize + 3 * D_PAD * 4        # 2x in + 2x out bufs + f32 acc
    cap = (budget - w_bytes) // per_row
    cap = max(8, min(2048, (cap // 8) * 8))               # full-sublane, bounded tile

    n8 = ((n + 7) // 8) * 8
    nblk = min(n8, cap)
    return nblk, tk, nk, int(vmem_limit)


def backbone_pallas(x_flat, w_exp):
    """Fused synthetic backbone on one resolution group: (N, C*HW) @ (C*HW, 128) -> (N, 128)."""
    n, k_dim = x_flat.shape
    nblk, tk, nk, vmem_limit = _tiling_plan(n, k_dim, x_flat.dtype.itemsize)

    # Zero-pad the batch up to a multiple of 8 sublanes: full-vreg tiles, unmasked stores.
    # Zero rows project to zero rows (no bias), and are sliced off below.
    n8 = ((n + 7) // 8) * 8
    if n8 != n:
        x_flat = jnp.pad(x_flat, ((0, n8 - n), (0, 0)))

    w_pipeline = pl.Buffered(1) if nk == 1 else pl.Buffered(2)
    grid = (pl.cdiv(n8, nblk), nk)   # reduction (K) axis last

    fused = pl.pallas_call(
        _fused_backbone_kernel,
        out_shape=jax.ShapeDtypeStruct((n8, D_PAD), jnp.float32),
        grid=grid,
        in_specs=[
            pl.BlockSpec((nblk, tk), lambda i, k: (i, k)),            # batch-tiled, pipelined
            pl.BlockSpec((tk, D_PAD), lambda i, k: (k, 0),
                         pipeline_mode=w_pipeline),                   # resident fused weight
        ],
        out_specs=pl.BlockSpec((nblk, D_PAD), lambda i, k: (i, 0)),   # lane-dense 128-wide
        scratch_shapes=[pltpu.VMEM((nblk, D_PAD), jnp.float32)],
        compiler_params=pltpu.CompilerParams(
            # TODO(synk): on v7x, verify "parallel" shards the batch axis across both
            # TensorCores; if not, switch this axis to pltpu.CORE_PARALLEL.
            dimension_semantics=("parallel", "arbitrary"),
            vmem_limit_bytes=vmem_limit,
        ),
    )(x_flat, w_exp)
    return fused[:n] if n8 != n else fused


def _expand_weights(w_out, w_zs, w_cls, hw, dtype):
    """Fuse the three projections and fold the mean-pool into the contraction."""
    w_fused = jnp.concatenate([w_out, w_zs, w_cls], axis=1).astype(jnp.float32)  # (C, 56)
    w_fused = jnp.pad(w_fused, ((0, 0), (0, D_PAD - D_TOTAL)))                   # (C, 128)
    # repeat each channel row HW times, scale by 1/HW (per-group scale: HW differs by group)
    w_exp = jnp.repeat(w_fused, hw, axis=0) / float(hw)                          # (C*HW, 128)
    return w_exp.astype(dtype)


def multi_crop_forward(x, w_out, w_zs, w_cls):
    """Pallas equivalent of MultiCropWrapper.forward (head is never applied in reference)."""
    if not isinstance(x, (list, tuple)):
        x = [x]
    # torch.unique_consecutive(..., return_counts=True)[1] on last-dim sizes, then cumsum
    widths = [int(inp.shape[-1]) for inp in x]
    counts = []
    prev = None
    for wd in widths:
        if counts and wd == prev:
            counts[-1] += 1
        else:
            counts.append(1)
        prev = wd
    idx_crops = np.cumsum(counts)

    outputs, zs_list, output_cls_list = [], [], []
    start_idx = 0
    for end_idx in idx_crops:
        group = x[start_idx:end_idx]
        ref_shape = tuple(group[0].shape[1:])
        for crop in group:
            if crop.ndim != 4 or tuple(crop.shape[1:]) != ref_shape:
                raise ValueError(
                    "crops inside one resolution group must share (C, H, W); got "
                    f"{tuple(crop.shape)} vs (N,) + {ref_shape}")
        c_in = int(ref_shape[0])
        hw = int(ref_shape[-2]) * int(ref_shape[-1])

        # bf16 crops stay bf16 into the kernel (halves the dominant HBM read, f32 accum);
        # everything else computes in f32.  No wrapper-side f32->bf16 casts.
        in_dtype = jnp.bfloat16 if group[0].dtype == jnp.bfloat16 else jnp.float32
        w_exp = _expand_weights(w_out, w_zs, w_cls, hw, in_dtype)

        # ONE pallas_call per resolution group: concatenate crops along the batch, exactly
        # mirroring backbone(torch.cat(group)) in the reference module.
        x_flat = jnp.concatenate(
            [crop.reshape(int(crop.shape[0]), c_in * hw).astype(in_dtype) for crop in group],
            axis=0)
        fused = backbone_pallas(x_flat, w_exp)

        outputs.append(fused[:, :D_OUT])
        zs_list.append(fused[:, D_OUT:D_OUT + D_ZS])
        output_cls_list.append(fused[:, D_OUT + D_ZS:D_TOTAL])
        start_idx = end_idx
    return outputs, zs_list, output_cls_list


multi_crop_forward_jit = jax.jit(multi_crop_forward)


if __name__ == "__main__":
    key = jax.random.PRNGKey(0)
    k_crops, k_wo, k_wz, k_wc = jax.random.split(key, 4)

    # deterministic synthetic backbone weights
    w_out = jax.random.normal(k_wo, (C_IN, D_OUT), jnp.float32) * 0.05
    w_zs = jax.random.normal(k_wz, (C_IN, D_ZS), jnp.float32) * 0.05
    w_cls = jax.random.normal(k_wc, (C_IN, N_CLS), jnp.float32) * 0.05

    # DINO-style multi-crop input: 2 global crops (16x16) + 2 local crops (8x8), batch=2
    kg0, kg1, kl0, kl1 = jax.random.split(k_crops, 4)
    crops = [
        jax.random.normal(kg0, (2, C_IN, 16, 16), jnp.float32),
        jax.random.normal(kg1, (2, C_IN, 16, 16), jnp.float32),
        jax.random.normal(kl0, (2, C_IN, 8, 8), jnp.float32),
        jax.random.normal(kl1, (2, C_IN, 8, 8), jnp.float32),
    ]

    outputs, zs_list, output_cls_list = multi_crop_forward_jit(crops, w_out, w_zs, w_cls)
    for t in outputs + zs_list + output_cls_list:
        jax.block_until_ready(t)

    # sanity: two resolution groups, each group batched 2 crops * batch 2 = 4
    assert len(outputs) == 2 and len(zs_list) == 2 and len(output_cls_list) == 2
    assert outputs[0].shape == (4, D_OUT)
    assert zs_list[0].shape == (4, D_ZS)
    assert output_cls_list[0].shape == (4, N_CLS)

    # cross-check against a float64 numpy reference of the mean-then-3-matmuls backbone
    w_out_np = np.asarray(w_out, np.float64)
    w_zs_np = np.asarray(w_zs, np.float64)
    w_cls_np = np.asarray(w_cls, np.float64)
    for grp, o, z, c in zip([crops[0:2], crops[2:4]], outputs, zs_list, output_cls_list):
        xb = np.concatenate([np.asarray(g, np.float64) for g in grp], axis=0)
        feats = xb.reshape(xb.shape[0], C_IN, -1).mean(axis=-1)
        np.testing.assert_allclose(np.asarray(o), feats @ w_out_np, rtol=1e-4, atol=1e-5)
        np.testing.assert_allclose(np.asarray(z), feats @ w_zs_np, rtol=1e-4, atol=1e-5)
        np.testing.assert_allclose(np.asarray(c), feats @ w_cls_np, rtol=1e-4, atol=1e-5)

    print("KERNEL_OK")
</pallas_src>

<mosaic_0001>
module attributes {stable_mosaic.version = 11 : i64} {
  func.func @_fused_backbone_kernel(%arg0: i32, %arg1: i32, %arg2: memref<8x1024xf32, #tpu.memory_space<vmem>>, %arg3: memref<1024x128xf32, #tpu.memory_space<vmem>>, %arg4: memref<8x128xf32, #tpu.memory_space<vmem>>, %arg5: memref<8x128xf32, #tpu.memory_space<vmem>>) attributes {dimension_semantics = [#tpu.dimension_semantics<parallel>, #tpu.dimension_semantics<arbitrary>], iteration_bounds = array<i64: 1, 1>, scalar_prefetch = 0 : i64, scratch_operands = 1 : i64, tpu.core_type = #tpu.core_type<tc>, window_params = [{transform_indices = @transform_0, window_bounds = array<i64: 8, 1024>}, {pipeline_mode = #tpu.pipeline_mode<synchronous>, transform_indices = @transform_1, window_bounds = array<i64: 1024, 128>}, {transform_indices = @transform_2, window_bounds = array<i64: 8, 128>}]} {
    %c0_i32 = arith.constant 0 : i32
    %0 = arith.cmpi eq, %arg1, %c0_i32 : i32
    %1 = arith.extui %0 : i1 to i32
    %c0_i32_0 = arith.constant 0 : i32
    %2 = arith.cmpi ne, %1, %c0_i32_0 : i32
    scf.if %2 {
      %cst_10 = arith.constant 0.000000e+00 : f32
      %12 = vector.broadcast %cst_10 : f32 to vector<8x128xf32>
      %c0_11 = arith.constant 0 : index
      %c0_12 = arith.constant 0 : index
      %13 = vector.load %arg5[%c0_11, %c0_12] : memref<8x128xf32, #tpu.memory_space<vmem>>, vector<8x128xf32>
      tpu.vector_store %arg5[%c0_11, %c0_12], %12 {strides = array<i32>} : memref<8x128xf32, #tpu.memory_space<vmem>>, vector<8x128xf32>,
    } else {
    }
    %c0 = arith.constant 0 : index
    %c0_1 = arith.constant 0 : index
    %3 = vector.load %arg5[%c0, %c0_1] : memref<8x128xf32, #tpu.memory_space<vmem>>, vector<8x128xf32>
    %c0_2 = arith.constant 0 : index
    %c0_3 = arith.constant 0 : index
    %4 = vector.load %arg2[%c0_2, %c0_3] : memref<8x1024xf32, #tpu.memory_space<vmem>>, vector<8x1024xf32>
    %c0_4 = arith.constant 0 : index
    %c0_5 = arith.constant 0 : index
    %5 = vector.load %arg3[%c0_4, %c0_5] : memref<1024x128xf32, #tpu.memory_space<vmem>>, vector<1024x128xf32>
    %cst = arith.constant dense<0.000000e+00> : vector<8x128xf32>
    %6 = tpu.matmul %4, %5, %cst {dimension_numbers = #tpu.dot_dimension_numbers<[1], [0], [0], [1], [0, 0, 1, 1], [], []>} : vector<8x1024xf32>, vector<1024x128xf32>, vector<8x128xf32> -> vector<8x128xf32>
    %7 = arith.addf %3, %6 : vector<8x128xf32>
    %c0_6 = arith.constant 0 : index
    %c0_7 = arith.constant 0 : index
    %8 = vector.load %arg5[%c0_6, %c0_7] : memref<8x128xf32, #tpu.memory_space<vmem>>, vector<8x128xf32>
    tpu.vector_store %arg5[%c0_6, %c0_7], %7 {strides = array<i32>} : memref<8x128xf32, #tpu.memory_space<vmem>>, vector<8x128xf32>,
    %c0_i32_8 = arith.constant 0 : i32
    %9 = arith.cmpi eq, %arg1, %c0_i32_8 : i32
    %10 = arith.extui %9 : i1 to i32
    %c0_i32_9 = arith.constant 0 : i32
    %11 = arith.cmpi ne, %10, %c0_i32_9 : i32
    scf.if %11 {
      %c0_10 = arith.constant 0 : index
      %c0_11 = arith.constant 0 : index
      %12 = vector.load %arg5[%c0_10, %c0_11] : memref<8x128xf32, #tpu.memory_space<vmem>>, vector<8x128xf32>
      %c0_12 = arith.constant 0 : index
      %c0_13 = arith.constant 0 : index
      %13 = vector.load %arg4[%c0_12, %c0_13] : memref<8x128xf32, #tpu.memory_space<vmem>>, vector<8x128xf32>
      tpu.vector_store %arg4[%c0_12, %c0_13], %12 {strides = array<i32>} : memref<8x128xf32, #tpu.memory_space<vmem>>, vector<8x128xf32>,
    } else {
    }
    return
  }
  func.func @transform_0(%arg0: i32, %arg1: i32) -> (i32, i32) {
    %c0_i32 = arith.constant 0 : i32
    return %arg0, %arg1 : i32, i32
  }
  func.func @transform_1(%arg0: i32, %arg1: i32) -> (i32, i32) {
    %c0_i32 = arith.constant 0 : i32
    %c0_i32_0 = arith.constant 0 : i32
    return %arg1, %c0_i32 : i32, i32
  }
  func.func @transform_2(%arg0: i32, %arg1: i32) -> (i32, i32) {
    %c0_i32 = arith.constant 0 : i32
    %c0_i32_0 = arith.constant 0 : i32
    return %arg0, %c0_i32 : i32, i32
  }
}

module attributes {stable_mosaic.version = 11 : i64} {
  func.func @_fused_backbone_kernel(%arg0: i32, %arg1: i32, %arg2: memref<8x256xf32, #tpu.memory_space<vmem>>, %arg3: memref<256x128xf32, #tpu.memory_space<vmem>>, %arg4: memref<8x128xf32, #tpu.memory_space<vmem>>, %arg5: memref<8x128xf32, #tpu.memory_space<vmem>>) attributes {dimension_semantics = [#tpu.dimension_semantics<parallel>, #tpu.dimension_semantics<arbitrary>], iteration_bounds = array<i64: 1, 1>, scalar_prefetch = 0 : i64, scratch_operands = 1 : i64, tpu.core_type = #tpu.core_type<tc>, window_params = [{transform_indices = @transform_0, window_bounds = array<i64: 8, 256>}, {pipeline_mode = #tpu.pipeline_mode<synchronous>, transform_indices = @transform_1, window_bounds = array<i64: 256, 128>}, {transform_indices = @transform_2, window_bounds = array<i64: 8, 128>}]} {
    %c0_i32 = arith.constant 0 : i32
    %0 = arith.cmpi eq, %arg1, %c0_i32 : i32
    %1 = arith.extui %0 : i1 to i32
    %c0_i32_0 = arith.constant 0 : i32
    %2 = arith.cmpi ne, %1, %c0_i32_0 : i32
    scf.if %2 {
      %cst_10 = arith.constant 0.000000e+00 : f32
      %12 = vector.broadcast %cst_10 : f32 to vector<8x128xf32>
      %c0_11 = arith.constant 0 : index
      %c0_12 = arith.constant 0 : index
      %13 = vector.load %arg5[%c0_11, %c0_12] : memref<8x128xf32, #tpu.memory_space<vmem>>, vector<8x128xf32>
      tpu.vector_store %arg5[%c0_11, %c0_12], %12 {strides = array<i32>} : memref<8x128xf32, #tpu.memory_space<vmem>>, vector<8x128xf32>,
    } else {
    }
    %c0 = arith.constant 0 : index
    %c0_1 = arith.constant 0 : index
    %3 = vector.load %arg5[%c0, %c0_1] : memref<8x128xf32, #tpu.memory_space<vmem>>, vector<8x128xf32>
    %c0_2 = arith.constant 0 : index
    %c0_3 = arith.constant 0 : index
    %4 = vector.load %arg2[%c0_2, %c0_3] : memref<8x256xf32, #tpu.memory_space<vmem>>, vector<8x256xf32>
    %c0_4 = arith.constant 0 : index
    %c0_5 = arith.constant 0 : index
    %5 = vector.load %arg3[%c0_4, %c0_5] : memref<256x128xf32, #tpu.memory_space<vmem>>, vector<256x128xf32>
    %cst = arith.constant dense<0.000000e+00> : vector<8x128xf32>
    %6 = tpu.matmul %4, %5, %cst {dimension_numbers = #tpu.dot_dimension_numbers<[1], [0], [0], [1], [0, 0, 1, 1], [], []>} : vector<8x256xf32>, vector<256x128xf32>, vector<8x128xf32> -> vector<8x128xf32>
    %7 = arith.addf %3, %6 : vector<8x128xf32>
    %c0_6 = arith.constant 0 : index
    %c0_7 = arith.constant 0 : index
    %8 = vector.load %arg5[%c0_6, %c0_7] : memref<8x128xf32, #tpu.memory_space<vmem>>, vector<8x128xf32>
    tpu.vector_store %arg5[%c0_6, %c0_7], %7 {strides = array<i32>} : memref<8x128xf32, #tpu.memory_space<vmem>>, vector<8x128xf32>,
    %c0_i32_8 = arith.constant 0 : i32
    %9 = arith.cmpi eq, %arg1, %c0_i32_8 : i32
    %10 = arith.extui %9 : i1 to i32
    %c0_i32_9 = arith.constant 0 : i32
    %11 = arith.cmpi ne, %10, %c0_i32_9 : i32
    scf.if %11 {
      %c0_10 = arith.constant 0 : index
      %c0_11 = arith.constant 0 : index
      %12 = vector.load %arg5[%c0_10, %c0_11] : memref<8x128xf32, #tpu.memory_space<vmem>>, vector<8x128xf32>
      %c0_12 = arith.constant 0 : index
      %c0_13 = arith.constant 0 : index
      %13 = vector.load %arg4[%c0_12, %c0_13] : memref<8x128xf32, #tpu.memory_space<vmem>>, vector<8x128xf32>
      tpu.vector_store %arg4[%c0_12, %c0_13], %12 {strides = array<i32>} : memref<8x128xf32, #tpu.memory_space<vmem>>, vector<8x128xf32>,
    } else {
    }
    return
  }
  func.func @transform_0(%arg0: i32, %arg1: i32) -> (i32, i32) {
    %c0_i32 = arith.constant 0 : i32
    return %arg0, %arg1 : i32, i32
  }
  func.func @transform_1(%arg0: i32, %arg1: i32) -> (i32, i32) {
    %c0_i32 = arith.constant 0 : i32
    %c0_i32_0 = arith.constant 0 : i32
    return %arg1, %c0_i32 : i32, i32
  }
  func.func @transform_2(%arg0: i32, %arg1: i32) -> (i32, i32) {
    %c0_i32 = arith.constant 0 : i32
    %c0_i32_0 = arith.constant 0 : i32
    return %arg0, %c0_i32 : i32, i32
  }
}

</mosaic_0001>

<bundles_post_ra>
// kernel: multi_crop_forward.3
= control target key start
LH: loop header
LB: loop body
LE: loop exit
PB: predicated region body
PF: predicated region fallthrough
CT: control target
= control target key end

     0   :  { %s222_s1 = inlined_call_operand.vmem [shape: f32[256,128], index: 1, kind: input, shape index: {}]   ;;  %s223_s0 = inlined_call_operand.vmem [shape: f32[8,256], index: 0, kind: input, shape index: {}]   ;;  %s224_s2 = inlined_call_operand.vmem [shape: f32[8,128], index: 2, kind: output, shape index: {}]  }
   0x1   :  { %v34_v0 = vld [vmem:[%s222_s1 + $0x78] sm:$0xff]  ;;  %v33_v2 = vld [vmem:[%s222_s1 + $0x70] sm:$0xff]  ;;  %v32_v4 = vld [vmem:[%s222_s1 + $0x68] sm:$0xff] }
   0x2   :  { %v50_v1 = vld [vmem:[%s222_s1 + $0xf8] sm:$0xff]  ;;  %51 = vmatpush.msra.mxu0 %v34_v0  ;;  %v49_v3 = vld [vmem:[%s222_s1 + $0xf0] sm:$0xff]  ;;  %v48_v5 = vld [vmem:[%s222_s1 + $0xe8] sm:$0xff] }
   0x3   :  { %71 = vmatpush.msra.mxu1 %v50_v1  ;;  %v31_v6 = vld [vmem:[%s222_s1 + $0x60] sm:$0xff]  ;;  %v30_v8 = vld [vmem:[%s222_s1 + $0x58] sm:$0xff]  ;;  %v29_v10 = vld [vmem:[%s222_s1 + $0x50] sm:$0xff] }
   0x4   :  { %52 = vmatpush.msra.mxu0 %v33_v2  ;;  %v47_v7 = vld [vmem:[%s222_s1 + $0xe0] sm:$0xff]  ;;  %v46_v9 = vld [vmem:[%s222_s1 + $0xd8] sm:$0xff]  ;;  %v45_v11 = vld [vmem:[%s222_s1 + $0xd0] sm:$0xff] }
   0x5   :  { %72 = vmatpush.msra.mxu1 %v49_v3  ;;  %v28_v12 = vld [vmem:[%s222_s1 + $0x48] sm:$0xff]  ;;  %v27_v14 = vld [vmem:[%s222_s1 + $0x40] sm:$0xff]  ;;  %v26_v16 = vld [vmem:[%s222_s1 + $0x38] sm:$0xff] }
   0x6   :  { %53 = vmatpush.msra.mxu0 %v32_v4  ;;  %v44_v13 = vld [vmem:[%s222_s1 + $0xc8] sm:$0xff]  ;;  %v43_v15 = vld [vmem:[%s222_s1 + $0xc0] sm:$0xff]  ;;  %v42_v17 = vld [vmem:[%s222_s1 + $0xb8] sm:$0xff] }
   0x7   :  { %73 = vmatpush.msra.mxu1 %v48_v5  ;;  %v25_v18 = vld [vmem:[%s222_s1 + $0x30] sm:$0xff]  ;;  %v24_v20 = vld [vmem:[%s222_s1 + $0x28] sm:$0xff]  ;;  %v23_v22 = vld [vmem:[%s222_s1 + $0x20] sm:$0xff] }
   0x8   :  { %54 = vmatpush.msra.mxu0 %v31_v6  ;;  %v41_v19 = vld [vmem:[%s222_s1 + $0xb0] sm:$0xff]  ;;  %v40_v21 = vld [vmem:[%s222_s1 + $0xa8] sm:$0xff]  ;;  %v39_v23 = vld [vmem:[%s222_s1 + $0xa0] sm:$0xff] }
   0x9   :  { %74 = vmatpush.msra.mxu1 %v47_v7  ;;  %v22_v24 = vld [vmem:[%s222_s1 + $0x18] sm:$0xff]  ;;  %v21_v26 = vld [vmem:[%s222_s1 + $0x10] sm:$0xff]  ;;  %v20_v28 = vld [vmem:[%s222_s1 + $0x8] sm:$0xff] }
   0xa   :  { %55 = vmatpush.msra.mxu0 %v30_v8  ;;  %v38_v25 = vld [vmem:[%s222_s1 + $0x98] sm:$0xff]  ;;  %v37_v27 = vld [vmem:[%s222_s1 + $0x90] sm:$0xff]  ;;  %v36_v29 = vld [vmem:[%s222_s1 + $0x88] sm:$0xff] }
   0xb   :  { %75 = vmatpush.msra.mxu1 %v46_v9  ;;  %v19_v30 = vld [vmem:[%s222_s1] sm:$0xff]  ;;  %v18_v33 = vld [vmem:[%s223_s0 + $0x8] sm:$0xff] }
   0xc   :  { %56 = vmatpush.msra.mxu0 %v29_v10  ;;  %v35_v31 = vld [vmem:[%s222_s1 + $0x80] sm:$0xff] }
   0xd   :  { %76 = vmatpush.msra.mxu1 %v45_v11  ;;  %v17_v32 = vld [vmem:[%s223_s0] sm:$0xff] }
   0xe   :  { %57 = vmatpush.msra.mxu0 %v28_v12 }
   0xf   :  { %77 = vmatpush.msra.mxu1 %v44_v13 }
  0x10   :  { %58 = vmatpush.msra.mxu0 %v27_v14 }
  0x11   :  { %78 = vmatpush.msra.mxu1 %v43_v15 }
  0x12   :  { %59 = vmatpush.msra.mxu0 %v26_v16 }
  0x13   :  { %79 = vmatpush.msra.mxu1 %v42_v17 }
  0x14   :  { %60 = vmatpush.msra.mxu0 %v25_v18 }
  0x15   :  { %80 = vmatpush.msra.mxu1 %v41_v19 }
  0x16   :  { %61 = vmatpush.msra.mxu0 %v24_v20 }
  0x17   :  { %81 = vmatpush.msra.mxu1 %v40_v21 }
  0x18   :  { %62 = vmatpush.msra.mxu0 %v23_v22 }
  0x19   :  { %82 = vmatpush.msra.mxu1 %v39_v23 }
  0x1a   :  { %63 = vmatpush.msra.mxu0 %v22_v24 }
  0x1b   :  { %83 = vmatpush.msra.mxu1 %v38_v25 }
  0x1c   :  { %64 = vmatpush.msra.mxu0 %v21_v26 }
  0x1d   :  { %84 = vmatpush.msra.mxu1 %v37_v27 }
  0x1e   :  { %65 = vmatpush.msra.mxu0 %v20_v28 }
  0x1f   :  { %85 = vmatpush.msra.mxu1 %v36_v29 }
  0x20   :  { %66 = vmatpush.msra.mxu0 %v19_v30 }
  0x21   :  { %86 = vmatpush.msra.mxu1 %v35_v31  ;;  %67 = vmatmul.f32.vlgmr.msra.gmra.mxu0 %v17_v32 }
  0x22   :  { %87 = vmatmul.f32.vlgmr.msra.gmra.mxu1 %v18_v33 }
  0x9e   :  { %v68_v34 = vpop.f32.mrf.mxu0 }
  0x9f   :  { %v88_v35 = vpop.f32.mrf.mxu1 }
  0xa0   :  { %v89_v36 = vadd.f32 %v88_v35, %v68_v34 }
  0xa2   :  { %97 = vst [vmem:[%s224_s2] sm:$0xff] %v89_v36 }

// kernel: multi_crop_forward.2
= control target key start
LH: loop header
LB: loop body
LE: loop exit
PB: predicated region body
PF: predicated region fallthrough
CT: control target
= control target key end

     0   :  { %s750_s1 = inlined_call_operand.vmem [shape: f32[1024,128], index: 1, kind: input, shape index: {}]   ;;  %s751_s0 = inlined_call_operand.vmem [shape: f32[8,1024], index: 0, kind: input, shape index: {}]   ;;  %s752_s2 = inlined_call_operand.vmem [shape: f32[8,128], index: 2, kind: output, shape index: {}]  }
   0x1   :  { %v40_v0 = vld [vmem:[%s750_s1 + $0x78] sm:$0xff]  ;;  %v39_v2 = vld [vmem:[%s750_s1 + $0x70] sm:$0xff]  ;;  %v38_v6 = vld [vmem:[%s750_s1 + $0x68] sm:$0xff] }
   0x2   :  { %v72_v1 = vld [vmem:[%s750_s1 + $0x178] sm:$0xff]  ;;  %153 = vmatpush.msra.mxu0 %v40_v0  ;;  %v71_v4 = vld [vmem:[%s750_s1 + $0x170] sm:$0xff]  ;;  %v70_v8 = vld [vmem:[%s750_s1 + $0x168] sm:$0xff] }
   0x3   :  { %193 = vmatpush.msra.mxu2 %v72_v1  ;;  %v56_v3 = vld [vmem:[%s750_s1 + $0xf8] sm:$0xff]  ;;  %v55_v7 = vld [vmem:[%s750_s1 + $0xf0] sm:$0xff]  ;;  %v54_v10 = vld [vmem:[%s750_s1 + $0xe8] sm:$0xff] }
   0x4   :  { %v88_v5 = vld [vmem:[%s750_s1 + $0x1f8] sm:$0xff]  ;;  %173 = vmatpush.msra.mxu1 %v56_v3  ;;  %154 = vmatpush.msra.mxu0 %v39_v2  ;;  %v87_v9 = vld [vmem:[%s750_s1 + $0x1f0] sm:$0xff]  ;;  %v37_v11 = vld [vmem:[%s750_s1 + $0x60] sm:$0xff] }
   0x5   :  { %213 = vmatpush.msra.mxu3 %v88_v5  ;;  %194 = vmatpush.msra.mxu2 %v71_v4  ;;  %v69_v12 = vld [vmem:[%s750_s1 + $0x160] sm:$0xff]  ;;  %v86_v13 = vld [vmem:[%s750_s1 + $0x1e8] sm:$0xff]  ;;  %v36_v16 = vld [vmem:[%s750_s1 + $0x58] sm:$0xff] }
   0x6   :  { %174 = vmatpush.msra.mxu1 %v55_v7  ;;  %155 = vmatpush.msra.mxu0 %v38_v6  ;;  %v53_v14 = vld [vmem:[%s750_s1 + $0xe0] sm:$0xff]  ;;  %v68_v17 = vld [vmem:[%s750_s1 + $0x158] sm:$0xff]  ;;  %v35_v20 = vld [vmem:[%s750_s1 + $0x50] sm:$0xff] }
   0x7   :  { %214 = vmatpush.msra.mxu3 %v87_v9  ;;  %195 = vmatpush.msra.mxu2 %v70_v8  ;;  %v85_v15 = vld [vmem:[%s750_s1 + $0x1e0] sm:$0xff]  ;;  %v52_v18 = vld [vmem:[%s750_s1 + $0xd8] sm:$0xff]  ;;  %v67_v21 = vld [vmem:[%s750_s1 + $0x150] sm:$0xff] }
   0x8   :  { %175 = vmatpush.msra.mxu1 %v54_v10  ;;  %156 = vmatpush.msra.mxu0 %v37_v11  ;;  %v84_v19 = vld [vmem:[%s750_s1 + $0x1d8] sm:$0xff]  ;;  %v51_v22 = vld [vmem:[%s750_s1 + $0xd0] sm:$0xff]  ;;  %v34_v24 = vld [vmem:[%s750_s1 + $0x48] sm:$0xff] }
   0x9   :  { %215 = vmatpush.msra.mxu3 %v86_v13  ;;  %196 = vmatpush.msra.mxu2 %v69_v12  ;;  %v83_v23 = vld [vmem:[%s750_s1 + $0x1d0] sm:$0xff]  ;;  %v66_v25 = vld [vmem:[%s750_s1 + $0x148] sm:$0xff]  ;;  %v33_v28 = vld [vmem:[%s750_s1 + $0x40] sm:$0xff] }
   0xa   :  { %176 = vmatpush.msra.mxu1 %v53_v14  ;;  %157 = vmatpush.msra.mxu0 %v36_v16  ;;  %v50_v26 = vld [vmem:[%s750_s1 + $0xc8] sm:$0xff]  ;;  %v65_v29 = vld [vmem:[%s750_s1 + $0x140] sm:$0xff]  ;;  %v32_v32 = vld [vmem:[%s750_s1 + $0x38] sm:$0xff] }
   0xb   :  { %216 = vmatpush.msra.mxu3 %v85_v15  ;;  %197 = vmatpush.msra.mxu2 %v68_v17  ;;  %v82_v27 = vld [vmem:[%s750_s1 + $0x1c8] sm:$0xff]  ;;  %v49_v30 = vld [vmem:[%s750_s1 + $0xc0] sm:$0xff]  ;;  %v64_v33 = vld [vmem:[%s750_s1 + $0x138] sm:$0xff] }
   0xc   :  { %177 = vmatpush.msra.mxu1 %v52_v18  ;;  %158 = vmatpush.msra.mxu0 %v35_v20  ;;  %v81_v31 = vld [vmem:[%s750_s1 + $0x1c0] sm:$0xff]  ;;  %v48_v34 = vld [vmem:[%s750_s1 + $0xb8] sm:$0xff]  ;;  %v31_v36 = vld [vmem:[%s750_s1 + $0x30] sm:$0xff] }
   0xd   :  { %217 = vmatpush.msra.mxu3 %v84_v19  ;;  %198 = vmatpush.msra.mxu2 %v67_v21  ;;  %v80_v35 = vld [vmem:[%s750_s1 + $0x1b8] sm:$0xff]  ;;  %v63_v37 = vld [vmem:[%s750_s1 + $0x130] sm:$0xff]  ;;  %v30_v40 = vld [vmem:[%s750_s1 + $0x28] sm:$0xff] }
   0xe   :  { %178 = vmatpush.msra.mxu1 %v51_v22  ;;  %159 = vmatpush.msra.mxu0 %v34_v24  ;;  %v47_v38 = vld [vmem:[%s750_s1 + $0xb0] sm:$0xff]  ;;  %v62_v41 = vld [vmem:[%s750_s1 + $0x128] sm:$0xff]  ;;  %v29_v44 = vld [vmem:[%s750_s1 + $0x20] sm:$0xff] }
   0xf   :  { %218 = vmatpush.msra.mxu3 %v83_v23  ;;  %199 = vmatpush.msra.mxu2 %v66_v25  ;;  %v79_v39 = vld [vmem:[%s750_s1 + $0x1b0] sm:$0xff]  ;;  %v46_v42 = vld [vmem:[%s750_s1 + $0xa8] sm:$0xff]  ;;  %v61_v45 = vld [vmem:[%s750_s1 + $0x120] sm:$0xff] }
  0x10   :  { %179 = vmatpush.msra.mxu1 %v50_v26  ;;  %160 = vmatpush.msra.mxu0 %v33_v28  ;;  %v78_v43 = vld [vmem:[%s750_s1 + $0x1a8] sm:$0xff]  ;;  %v45_v46 = vld [vmem:[%s750_s1 + $0xa0] sm:$0xff]  ;;  %v28_v48 = vld [vmem:[%s750_s1 + $0x18] sm:$0xff] }
  0x11   :  { %219 = vmatpush.msra.mxu3 %v82_v27  ;;  %200 = vmatpush.msra.mxu2 %v65_v29  ;;  %v77_v47 = vld [vmem:[%s750_s1 + $0x1a0] sm:$0xff]  ;;  %v60_v49 = vld [vmem:[%s750_s1 + $0x118] sm:$0xff]  ;;  %v27_v52 = vld [vmem:[%s750_s1 + $0x10] sm:$0xff] }
  0x12   :  { %180 = vmatpush.msra.mxu1 %v49_v30  ;;  %161 = vmatpush.msra.mxu0 %v32_v32  ;;  %v44_v50 = vld [vmem:[%s750_s1 + $0x98] sm:$0xff]  ;;  %v59_v53 = vld [vmem:[%s750_s1 + $0x110] sm:$0xff]  ;;  %v26_v56 = vld [vmem:[%s750_s1 + $0x8] sm:$0xff] }
  0x13   :  { %220 = vmatpush.msra.mxu3 %v81_v31  ;;  %201 = vmatpush.msra.mxu2 %v64_v33  ;;  %v76_v51 = vld [vmem:[%s750_s1 + $0x198] sm:$0xff]  ;;  %v43_v54 = vld [vmem:[%s750_s1 + $0x90] sm:$0xff]  ;;  %v58_v57 = vld [vmem:[%s750_s1 + $0x108] sm:$0xff] }
  0x14   :  { %181 = vmatpush.msra.mxu1 %v48_v34  ;;  %162 = vmatpush.msra.mxu0 %v31_v36  ;;  %v75_v55 = vld [vmem:[%s750_s1 + $0x190] sm:$0xff]  ;;  %v42_v58 = vld [vmem:[%s750_s1 + $0x88] sm:$0xff]  ;;  %v25_v60 = vld [vmem:[%s750_s1] sm:$0xff] }
  0x15   :  { %221 = vmatpush.msra.mxu3 %v80_v35  ;;  %202 = vmatpush.msra.mxu2 %v63_v37  ;;  %v74_v59 = vld [vmem:[%s750_s1 + $0x188] sm:$0xff]  ;;  %v57_v61 = vld [vmem:[%s750_s1 + $0x100] sm:$0xff]  ;;  %v104_v62 = vld [vmem:[%s750_s1 + $0x278] sm:$0xff] }
  0x16   :  { %182 = vmatpush.msra.mxu1 %v47_v38  ;;  %163 = vmatpush.msra.mxu0 %v30_v40  ;;  %v136_v63 = vld [vmem:[%s750_s1 + $0x378] sm:$0xff]  ;;  %v41_v0 = vld [vmem:[%s750_s1 + $0x80] sm:$0xff]  ;;  %v103_v2 = vld [vmem:[%s750_s1 + $0x270] sm:$0xff] }
  0x17   :  { %222 = vmatpush.msra.mxu3 %v79_v39  ;;  %203 = vmatpush.msra.mxu2 %v62_v41  ;;  %v73_v1 = vld [vmem:[%s750_s1 + $0x180] sm:$0xff]  ;;  %v120_v3 = vld [vmem:[%s750_s1 + $0x2f8] sm:$0xff]  ;;  %v135_v4 = vld [vmem:[%s750_s1 + $0x370] sm:$0xff] }
  0x18   :  { %183 = vmatpush.msra.mxu1 %v46_v42  ;;  %164 = vmatpush.msra.mxu0 %v29_v44  ;;  %v152_v5 = vld [vmem:[%s750_s1 + $0x3f8] sm:$0xff]  ;;  %v102_v6 = vld [vmem:[%s750_s1 + $0x268] sm:$0xff]  ;;  %v119_v7 = vld [vmem:[%s750_s1 + $0x2f0] sm:$0xff] }
  0x19   :  { %223 = vmatpush.msra.mxu3 %v78_v43  ;;  %204 = vmatpush.msra.mxu2 %v61_v45  ;;  %v134_v8 = vld [vmem:[%s750_s1 + $0x368] sm:$0xff]  ;;  %v151_v9 = vld [vmem:[%s750_s1 + $0x3f0] sm:$0xff]  ;;  %v101_v10 = vld [vmem:[%s750_s1 + $0x260] sm:$0xff] }
  0x1a   :  { %184 = vmatpush.msra.mxu1 %v45_v46  ;;  %165 = vmatpush.msra.mxu0 %v28_v48  ;;  %v118_v11 = vld [vmem:[%s750_s1 + $0x2e8] sm:$0xff]  ;;  %v133_v12 = vld [vmem:[%s750_s1 + $0x360] sm:$0xff]  ;;  %v100_v14 = vld [vmem:[%s750_s1 + $0x258] sm:$0xff] }
  0x1b   :  { %224 = vmatpush.msra.mxu3 %v77_v47  ;;  %205 = vmatpush.msra.mxu2 %v60_v49  ;;  %v150_v13 = vld [vmem:[%s750_s1 + $0x3e8] sm:$0xff]  ;;  %v117_v15 = vld [vmem:[%s750_s1 + $0x2e0] sm:$0xff]  ;;  %v132_v16 = vld [vmem:[%s750_s1 + $0x358] sm:$0xff] }
  0x1c   :  { %185 = vmatpush.msra.mxu1 %v44_v50  ;;  %166 = vmatpush.msra.mxu0 %v27_v52  ;;  %v149_v17 = vld [vmem:[%s750_s1 + $0x3e0] sm:$0xff]  ;;  %v99_v18 = vld [vmem:[%s750_s1 + $0x250] sm:$0xff]  ;;  %v116_v19 = vld [vmem:[%s750_s1 + $0x2d8] sm:$0xff] }
  0x1d   :  { %225 = vmatpush.msra.mxu3 %v76_v51  ;;  %206 = vmatpush.msra.mxu2 %v59_v53  ;;  %v131_v20 = vld [vmem:[%s750_s1 + $0x350] sm:$0xff]  ;;  %v148_v21 = vld [vmem:[%s750_s1 + $0x3d8] sm:$0xff]  ;;  %v98_v22 = vld [vmem:[%s750_s1 + $0x248] sm:$0xff] }
  0x1e   :  { %186 = vmatpush.msra.mxu1 %v43_v54  ;;  %167 = vmatpush.msra.mxu0 %v26_v56  ;;  %v115_v23 = vld [vmem:[%s750_s1 + $0x2d0] sm:$0xff]  ;;  %v130_v24 = vld [vmem:[%s750_s1 + $0x348] sm:$0xff]  ;;  %v97_v26 = vld [vmem:[%s750_s1 + $0x240] sm:$0xff] }
  0x1f   :  { %226 = vmatpush.msra.mxu3 %v75_v55  ;;  %207 = vmatpush.msra.mxu2 %v58_v57  ;;  %v147_v25 = vld [vmem:[%s750_s1 + $0x3d0] sm:$0xff]  ;;  %v114_v27 = vld [vmem:[%s750_s1 + $0x2c8] sm:$0xff]  ;;  %v129_v28 = vld [vmem:[%s750_s1 + $0x340] sm:$0xff] }
  0x20   :  { %187 = vmatpush.msra.mxu1 %v42_v58  ;;  %168 = vmatpush.msra.mxu0 %v25_v60  ;;  %v146_v29 = vld [vmem:[%s750_s1 + $0x3c8] sm:$0xff]  ;;  %v96_v30 = vld [vmem:[%s750_s1 + $0x238] sm:$0xff]  ;;  %v113_v31 = vld [vmem:[%s750_s1 + $0x2c0] sm:$0xff] }
  0x21   :  { %227 = vmatpush.msra.mxu3 %v74_v59  ;;  %208 = vmatpush.msra.mxu2 %v57_v61  ;;  %v128_v32 = vld [vmem:[%s750_s1 + $0x338] sm:$0xff]  ;;  %v145_v33 = vld [vmem:[%s750_s1 + $0x3c0] sm:$0xff]  ;;  %v95_v34 = vld [vmem:[%s750_s1 + $0x230] sm:$0xff] }
  0x22   :  { %233 = vmatpush.msrb.mxu0 %v104_v62  ;;  %188 = vmatpush.msra.mxu1 %v41_v0  ;;  %v112_v35 = vld [vmem:[%s750_s1 + $0x2b8] sm:$0xff]  ;;  %v127_v36 = vld [vmem:[%s750_s1 + $0x330] sm:$0xff]  ;;  %v94_v38 = vld [vmem:[%s750_s1 + $0x228] sm:$0xff] }
  0x23   :  { %273 = vmatpush.msrb.mxu2 %v136_v63  ;;  %228 = vmatpush.msra.mxu3 %v73_v1  ;;  %v144_v37 = vld [vmem:[%s750_s1 + $0x3b8] sm:$0xff]  ;;  %v111_v39 = vld [vmem:[%s750_s1 + $0x2b0] sm:$0xff]  ;;  %v126_v40 = vld [vmem:[%s750_s1 + $0x328] sm:$0xff] }
  0x24   :  { %234 = vmatpush.msrb.mxu0 %v103_v2  ;;  %253 = vmatpush.msrb.mxu1 %v120_v3  ;;  %v143_v41 = vld [vmem:[%s750_s1 + $0x3b0] sm:$0xff]  ;;  %v93_v43 = vld [vmem:[%s750_s1 + $0x220] sm:$0xff]  ;;  %v110_v44 = vld [vmem:[%s750_s1 + $0x2a8] sm:$0xff] }
  0x25   :  { %274 = vmatpush.msrb.mxu2 %v135_v4  ;;  %293 = vmatpush.msrb.mxu3 %v152_v5  ;;  %v19_v42 = vld [vmem:[%s751_s0 + $0x10] sm:$0xff]  ;;  %v125_v45 = vld [vmem:[%s750_s1 + $0x320] sm:$0xff]  ;;  %v142_v46 = vld [vmem:[%s750_s1 + $0x3a8] sm:$0xff] }
  0x26   :  { %235 = vmatpush.msrb.mxu0 %v102_v6  ;;  %254 = vmatpush.msrb.mxu1 %v119_v7  ;;  %v17_v47 = vld [vmem:[%s751_s0] sm:$0xff]  ;;  %v20_v48 = vld [vmem:[%s751_s0 + $0x18] sm:$0xff]  ;;  %v18_v53 = vld [vmem:[%s751_s0 + $0x8] sm:$0xff] }
  0x27   :  { %275 = vmatpush.msrb.mxu2 %v134_v8  ;;  %294 = vmatpush.msrb.mxu3 %v151_v9  ;;  %v92_v49 = vld [vmem:[%s750_s1 + $0x218] sm:$0xff]  ;;  %v109_v50 = vld [vmem:[%s750_s1 + $0x2a0] sm:$0xff]  ;;  %v91_v54 = vld [vmem:[%s750_s1 + $0x210] sm:$0xff] }
  0x28   :  { %236 = vmatpush.msrb.mxu0 %v101_v10  ;;  %255 = vmatpush.msrb.mxu1 %v118_v11  ;;  %v124_v51 = vld [vmem:[%s750_s1 + $0x318] sm:$0xff]  ;;  %v141_v52 = vld [vmem:[%s750_s1 + $0x3a0] sm:$0xff]  ;;  %v123_v56 = vld [vmem:[%s750_s1 + $0x310] sm:$0xff] }
  0x29   :  { %276 = vmatpush.msrb.mxu2 %v133_v12  ;;  %295 = vmatpush.msrb.mxu3 %v150_v13  ;;  %v108_v55 = vld [vmem:[%s750_s1 + $0x298] sm:$0xff]  ;;  %v90_v58 = vld [vmem:[%s750_s1 + $0x208] sm:$0xff]  ;;  %v107_v59 = vld [vmem:[%s750_s1 + $0x290] sm:$0xff] }
  0x2a   :  { %237 = vmatpush.msrb.mxu0 %v100_v14  ;;  %256 = vmatpush.msrb.mxu1 %v117_v15  ;;  %v140_v57 = vld [vmem:[%s750_s1 + $0x398] sm:$0xff]  ;;  %v122_v60 = vld [vmem:[%s750_s1 + $0x308] sm:$0xff]  ;;  %v139_v61 = vld [vmem:[%s750_s1 + $0x390] sm:$0xff] }
  0x2b   :  { %277 = vmatpush.msrb.mxu2 %v132_v16  ;;  %296 = vmatpush.msrb.mxu3 %v149_v17  ;;  %v89_v62 = vld [vmem:[%s750_s1 + $0x200] sm:$0xff]  ;;  %v106_v63 = vld [vmem:[%s750_s1 + $0x288] sm:$0xff]  ;;  %v23_v3 = vld [vmem:[%s751_s0 + $0x30] sm:$0xff] }
  0x2c   :  { %238 = vmatpush.msrb.mxu0 %v99_v18  ;;  %257 = vmatpush.msrb.mxu1 %v116_v19  ;;  %v121_v0 = vld [vmem:[%s750_s1 + $0x300] sm:$0xff]  ;;  %v138_v1 = vld [vmem:[%s750_s1 + $0x388] sm:$0xff]  ;;  %v24_v7 = vld [vmem:[%s751_s0 + $0x38] sm:$0xff] }
  0x2d   :  { %278 = vmatpush.msrb.mxu2 %v131_v20  ;;  %297 = vmatpush.msrb.mxu3 %v148_v21  ;;  %v21_v2 = vld [vmem:[%s751_s0 + $0x20] sm:$0xff]  ;;  %v22_v6 = vld [vmem:[%s751_s0 + $0x28] sm:$0xff] }
  0x2e   :  { %239 = vmatpush.msrb.mxu0 %v98_v22  ;;  %258 = vmatpush.msrb.mxu1 %v115_v23  ;;  %v105_v4 = vld [vmem:[%s750_s1 + $0x280] sm:$0xff] }
  0x2f   :  { %279 = vmatpush.msrb.mxu2 %v130_v24  ;;  %298 = vmatpush.msrb.mxu3 %v147_v25  ;;  %v137_v5 = vld [vmem:[%s750_s1 + $0x380] sm:$0xff] }
  0x30   :  { %240 = vmatpush.msrb.mxu0 %v97_v26  ;;  %259 = vmatpush.msrb.mxu1 %v114_v27 }
  0x31   :  { %280 = vmatpush.msrb.mxu2 %v129_v28  ;;  %299 = vmatpush.msrb.mxu3 %v146_v29 }
  0x32   :  { %241 = vmatpush.msrb.mxu0 %v96_v30  ;;  %260 = vmatpush.msrb.mxu1 %v113_v31 }
  0x33   :  { %281 = vmatpush.msrb.mxu2 %v128_v32  ;;  %300 = vmatpush.msrb.mxu3 %v145_v33 }
  0x34   :  { %242 = vmatpush.msrb.mxu0 %v95_v34  ;;  %261 = vmatpush.msrb.mxu1 %v112_v35 }
  0x35   :  { %282 = vmatpush.msrb.mxu2 %v127_v36  ;;  %301 = vmatpush.msrb.mxu3 %v144_v37 }
  0x36   :  { %243 = vmatpush.msrb.mxu0 %v94_v38  ;;  %262 = vmatpush.msrb.mxu1 %v111_v39 }
  0x37   :  { %283 = vmatpush.msrb.mxu2 %v126_v40  ;;  %302 = vmatpush.msrb.mxu3 %v143_v41 }
  0x38   :  { %209 = vmatmul.f32.vlgmr.msra.gmra.mxu2 %v19_v42  ;;  %244 = vmatpush.msrb.mxu0 %v93_v43 }
  0x39   :  { %263 = vmatpush.msrb.mxu1 %v110_v44  ;;  %284 = vmatpush.msrb.mxu2 %v125_v45 }
  0x3a   :  { %303 = vmatpush.msrb.mxu3 %v142_v46  ;;  %169 = vmatmul.f32.vlgmr.msra.gmra.mxu0 %v17_v47 }
  0x3b   :  { %229 = vmatmul.f32.vlgmr.msra.gmra.mxu3 %v20_v48  ;;  %245 = vmatpush.msrb.mxu0 %v92_v49 }
  0x3c   :  { %264 = vmatpush.msrb.mxu1 %v109_v50  ;;  %285 = vmatpush.msrb.mxu2 %v124_v51 }
  0x3d   :  { %304 = vmatpush.msrb.mxu3 %v141_v52  ;;  %189 = vmatmul.f32.vlgmr.msra.gmra.mxu1 %v18_v53 }
  0x3e   :  { %246 = vmatpush.msrb.mxu0 %v91_v54  ;;  %265 = vmatpush.msrb.mxu1 %v108_v55 }
  0x3f   :  { %286 = vmatpush.msrb.mxu2 %v123_v56  ;;  %305 = vmatpush.msrb.mxu3 %v140_v57 }
  0x40   :  { %247 = vmatpush.msrb.mxu0 %v90_v58  ;;  %266 = vmatpush.msrb.mxu1 %v107_v59 }
  0x41   :  { %287 = vmatpush.msrb.mxu2 %v122_v60  ;;  %306 = vmatpush.msrb.mxu3 %v139_v61 }
  0x42   :  { %248 = vmatpush.msrb.mxu0 %v89_v62  ;;  %267 = vmatpush.msrb.mxu1 %v106_v63 }
  0x43   :  { %288 = vmatpush.msrb.mxu2 %v121_v0  ;;  %307 = vmatpush.msrb.mxu3 %v138_v1 }
  0x44   :  { %249 = vmatmul.f32.vlgmr.msrb.gmra.mxu0 %v21_v2  ;;  %289 = vmatmul.f32.vlgmr.msrb.gmra.mxu2 %v23_v3 }
  0x45   :  { %268 = vmatpush.msrb.mxu1 %v105_v4  ;;  %308 = vmatpush.msrb.mxu3 %v137_v5 }
  0x46   :  { %269 = vmatmul.f32.vlgmr.msrb.gmra.mxu1 %v22_v6  ;;  %309 = vmatmul.f32.vlgmr.msrb.gmra.mxu3 %v24_v7 }
  0xb7   :  { %v170_v8 = vpop.f32.mrf.mxu0 }
  0xba   :  { %v190_v9 = vpop.f32.mrf.mxu1 }
  0xbb   :  { %v191_v10 = vadd.f32 %v190_v9, %v170_v8  ;;  %v210_v11 = vpop.f32.mrf.mxu2 }
  0xbd   :  { %v211_v12 = vadd.f32 %v210_v11, %v191_v10 }
  0xbe   :  { %v230_v13 = vpop.f32.mrf.mxu3 }
  0xbf   :  { %v231_v14 = vadd.f32 %v230_v13, %v211_v12 }
  0xc1   :  { %v250_v15 = vpop.f32.mrf.mxu0 }
  0xc2   :  { %v251_v16 = vadd.f32 %v250_v15, %v231_v14 }
  0xc3   :  { %v270_v17 = vpop.f32.mrf.mxu1 }
  0xc4   :  { %v271_v18 = vadd.f32 %v270_v17, %v251_v16 }
  0xc7   :  { %v290_v19 = vpop.f32.mrf.mxu2 }
  0xc8   :  { %v291_v20 = vadd.f32 %v290_v19, %v271_v18 }
  0xc9   :  { %v310_v21 = vpop.f32.mrf.mxu3 }
  0xca   :  { %v311_v22 = vadd.f32 %v310_v21, %v291_v20 }
  0xcc   :  { %319 = vst [vmem:[%s752_s2] sm:$0xff] %v311_v22 }

</bundles_post_ra>
